<compile_context>
chip_gen: v6e
topology: v6e:2x2x1
jax: 0.10.0
libtpu: 0.0.40
codegen_flags: <defaults>
</compile_context>

<pallas_src>
import jax
import jax.numpy as jnp
from jax import lax
from jax.experimental import pallas as pl
from jax.experimental.pallas import tpu as pltpu

IMG_SIZE = 2048
LANES = 128        # lane width (last dim of every tile)
SUB = 8            # sublane granularity (second-minor block dim must be a multiple)
TM_MAX = 128       # sublane-tiles per grid step -> 128*128 = 16384 points per step

_WGS84_A = 6378137.0
_WGS84_E2 = 6.69437999014e-3


def _proj_kernel(cam_ref, pts_ref, out_ref):
    """cam_ref: SMEM (16,) f32 camera constants.
       pts_ref: VMEM (6, tm, 128) point features.
       out_ref: VMEM (4, tm, 128) [img_row, img_col, intensity, face_code]."""
    slat = pts_ref[0]
    clat = pts_ref[1]
    slon = pts_ref[2]
    clon = pts_ref[3]
    alt = pts_ref[4]
    inten = pts_ref[5]

    # ---- lla2ecef (WGS84); rsqrt routes to the EUP slot (no f32 divide/sqrt) ----
    nrad = _WGS84_A * lax.rsqrt(1.0 - _WGS84_E2 * slat * slat)
    ex = (nrad + alt) * clat * clon
    ey = (nrad + alt) * clat * slon
    ez = (nrad * (1.0 - _WGS84_E2) + alt) * slat

    # ---- ecef2enu (camera ECEF origin + ENU rotation from SMEM scalars) ----
    # TODO(synk): f32 ECEF (~6.4e6 m) minus the camera origin loses ~0.5-1 m to
    # cancellation vs a float64 reference; a hi/lo split would recover it.
    dx = ex - cam_ref[0]
    dy = ey - cam_ref[1]
    dz = ez - cam_ref[2]
    s0 = cam_ref[3]   # sin(lat0)
    c0 = cam_ref[4]   # cos(lat0)
    s1 = cam_ref[5]   # sin(lon0)
    c1 = cam_ref[6]   # cos(lon0)
    e = -s1 * dx + c1 * dy
    n = -s0 * c1 * dx - s0 * s1 * dy + c0 * dz
    u = c0 * c1 * dx + c0 * s1 * dy + s0 * dz

    # ---- enu2cam (quaternion rotation matrix, row-major in SMEM[7:16]) ----
    cx = cam_ref[7] * e + cam_ref[8] * n + cam_ref[9] * u
    cy = cam_ref[10] * e + cam_ref[11] * n + cam_ref[12] * u
    cz = cam_ref[13] * e + cam_ref[14] * n + cam_ref[15] * u

    # ---- frustum classification (masks are mutually exclusive; strict '>' as in ref) ----
    acx = jnp.abs(cx)
    acy = jnp.abs(cy)
    acz = jnp.abs(cz)
    m_front = (cz > 0) & (cz > acx) & (cz > acy)
    m_back = (cz < 0) & (-cz > acx) & (-cz > acy)
    m_left = (cx < 0) & (-cx > acz) & (-cx > acy)
    m_right = (cx > 0) & (cx > acz) & (cx > acy)
    valid = m_front | m_back | m_left | m_right

    # per-face projection arguments:
    #   front: ( cx,  cy,  cz)   back : ( cx, -cy,  cz)
    #   left : ( cz,  cy, -cx)   right: (-cz,  cy,  cx)
    px = jnp.where(m_left, cz, jnp.where(m_right, -cz, cx))
    py = jnp.where(m_back, -cy, cy)
    pz = jnp.where(m_left, -cx, jnp.where(m_right, cx, cz))

    # ---- cam2image: one reciprocal + two multiplies instead of two divides ----
    half = IMG_SIZE * 0.5
    inv_z = pl.reciprocal(jnp.where(valid, pz, 1.0), approx=False)
    r = jnp.clip(jnp.floor(px * inv_z * half + half), 0.0, IMG_SIZE - 1.0)
    c = jnp.clip(jnp.floor(py * inv_z * half + half), 0.0, IMG_SIZE - 1.0)

    code = jnp.where(
        m_front, 0.0,
        jnp.where(m_back, 1.0,
                  jnp.where(m_left, 2.0,
                            jnp.where(m_right, 3.0, -1.0))))

    # full-tile, lane-dense stores (no sublane-interleaving concatenate)
    out_ref[0] = r
    out_ref[1] = c
    out_ref[2] = inten
    out_ref[3] = code


def build_camera_constants(cam_params):
    """cam_params: (7,) [lat, lon, alt, qs, qx, qy, qz] -> (16,) f32 kernel constants."""
    lat0 = jnp.deg2rad(cam_params[0])
    lon0 = jnp.deg2rad(cam_params[1])
    alt0 = cam_params[2]
    s0, c0 = jnp.sin(lat0), jnp.cos(lat0)
    s1, c1 = jnp.sin(lon0), jnp.cos(lon0)
    nrad = _WGS84_A / jnp.sqrt(1.0 - _WGS84_E2 * s0 * s0)
    cxe = (nrad + alt0) * c0 * c1
    cye = (nrad + alt0) * c0 * s1
    cze = (nrad * (1.0 - _WGS84_E2) + alt0) * s0

    # enu2cam is called with (-qs, qx, qy, qz) in the reference forward.
    w, x, y, z = -cam_params[3], cam_params[4], cam_params[5], cam_params[6]
    nq = jnp.sqrt(w * w + x * x + y * y + z * z)
    w, x, y, z = w / nq, x / nq, y / nq, z / nq
    R = jnp.stack([
        1 - 2 * (y * y + z * z), 2 * (x * y - w * z), 2 * (x * z + w * y),
        2 * (x * y + w * z), 1 - 2 * (x * x + z * z), 2 * (y * z - w * x),
        2 * (x * z - w * y), 2 * (y * z + w * x), 1 - 2 * (x * x + y * y),
    ])
    return jnp.concatenate(
        [jnp.stack([cxe, cye, cze, s0, c0, s1, c1]), R]).astype(jnp.float32)


def project_points_pallas(points, cam_consts):
    """points: (N, 4) f32 [lat_deg, lon_deg, alt, intensity] ->
       (4, N) f32 rows = [img_row, img_col, intensity, face_code]."""
    n = points.shape[0]
    lat = jnp.deg2rad(points[:, 0])
    lon = jnp.deg2rad(points[:, 1])
    # TODO(synk): sin/cos stay in JAX (Mosaic transcendental coverage); the rest of the
    # lla2ecef/ecef2enu/enu2cam/cam2image chain runs in the kernel.
    feats = jnp.stack(
        [jnp.sin(lat), jnp.cos(lat), jnp.sin(lon), jnp.cos(lon),
         points[:, 2], points[:, 3]], axis=0).astype(jnp.float32)        # (6, N)

    # Tile geometry: lane-dense (tm, 128) tiles, tm a multiple of 8; when there is more
    # than one sublane-tile of work, keep >= 2 grid steps so v7x's two TensorCores can
    # both be used via dimension_semantics=("parallel",).
    n_tiles = (n + LANES - 1) // LANES
    n_tiles = ((n_tiles + SUB - 1) // SUB) * SUB
    tm = min(TM_MAX, n_tiles)
    if n_tiles > SUB and tm == n_tiles:
        tm = (((n_tiles // 2) + SUB - 1) // SUB) * SUB
    n_tiles = ((n_tiles + tm - 1) // tm) * tm
    n_pad = n_tiles * LANES
    grid = n_tiles // tm

    feats = jnp.pad(feats, ((0, 0), (0, n_pad - n))).reshape(6, n_tiles, LANES)

    out = pl.pallas_call(
        _proj_kernel,
        out_shape=jax.ShapeDtypeStruct((4, n_tiles, LANES), jnp.float32),
        grid=(grid,),
        in_specs=[
            pl.BlockSpec(memory_space=pltpu.MemorySpace.SMEM),       # camera constants
            pl.BlockSpec((6, tm, LANES), lambda i: (0, i, 0)),       # point features
        ],
        out_specs=pl.BlockSpec((4, tm, LANES), lambda i: (0, i, 0)),
        compiler_params=pltpu.CompilerParams(
            dimension_semantics=("parallel",)),
    )(cam_consts, feats)
    return out.reshape(4, n_pad)[:, :n]


def scatter_images(proj, size=IMG_SIZE):
    """proj: (4, N) [row, col, intensity, face_code] -> (front, back, left, right).
       One fused scatter onto a (4, size, size) slab; invalid points get face index 4
       and are dropped."""
    # TODO(synk): duplicate pixel hits — PyTorch keeps the last write, JAX scatter
    # write order is unspecified; results may differ on overlapping points.
    face = proj[3]
    face_idx = jnp.where(face >= 0.0, face, 4.0).astype(jnp.int32)
    row = proj[0].astype(jnp.int32)
    col = proj[1].astype(jnp.int32)
    imgs = jnp.zeros((4, size, size), jnp.float32)
    imgs = imgs.at[face_idx, row, col].set(proj[2], mode="drop")
    return imgs[0], imgs[1], imgs[2], imgs[3]


def model_forward(points, cam_params):
    cam_consts = build_camera_constants(cam_params)
    proj = project_points_pallas(points, cam_consts)
    return scatter_images(proj)


if __name__ == "__main__":
    key = jax.random.PRNGKey(0)
    k_lat, k_lon, k_alt, k_quat, k_int = jax.random.split(key, 5)

    # Deterministic synthetic stand-ins for the CSV-loaded point cloud / camera config.
    N = 512
    cam_lat, cam_lon, cam_alt = 37.7749, -122.4194, 10.0
    quat = jnp.array([1.0, 0.0, 0.0, 0.0]) + 0.1 * jax.random.normal(k_quat, (4,))
    cam_params = jnp.concatenate(
        [jnp.array([cam_lat, cam_lon, cam_alt], jnp.float32),
         quat.astype(jnp.float32)])                                   # (7,)

    lat = cam_lat + 0.001 * jax.random.normal(k_lat, (N,))
    lon = cam_lon + 0.001 * jax.random.normal(k_lon, (N,))
    alt = cam_alt + 20.0 * jax.random.normal(k_alt, (N,))
    intensity = 255.0 * jax.random.uniform(k_int, (N,))
    points = jnp.stack([lat, lon, alt, intensity], axis=1).astype(jnp.float32)  # (N, 4)

    front, back, left, right = model_forward(points, cam_params)
    jax.block_until_ready((front, back, left, right))
    print("KERNEL_OK")
</pallas_src>

<mosaic_0001>
module attributes {stable_mosaic.version = 11 : i64} {
  func.func @_proj_kernel(%arg0: i32, %arg1: memref<16xf32, #tpu.memory_space<smem>>, %arg2: memref<6x8x128xf32, #tpu.memory_space<vmem>>, %arg3: memref<4x8x128xf32, #tpu.memory_space<vmem>>) attributes {dimension_semantics = [#tpu.dimension_semantics<parallel>], iteration_bounds = array<i64: 1>, scalar_prefetch = 0 : i64, scratch_operands = 0 : i64, tpu.core_type = #tpu.core_type<tc>, window_params = [{transform_indices = @transform_0, window_bounds = array<i64: 16>}, {transform_indices = @transform_1, window_bounds = array<i64: 6, 8, 128>}, {transform_indices = @transform_2, window_bounds = array<i64: 4, 8, 128>}]} {
    %c0 = arith.constant 0 : index
    %c0_0 = arith.constant 0 : index
    %c0_1 = arith.constant 0 : index
    %0 = vector.load %arg2[%c0, %c0_0, %c0_1] : memref<6x8x128xf32, #tpu.memory_space<vmem>>, vector<1x8x128xf32>
    %1 = vector.shape_cast %0 : vector<1x8x128xf32> to vector<8x128xf32>
    %c1 = arith.constant 1 : index
    %c0_2 = arith.constant 0 : index
    %c0_3 = arith.constant 0 : index
    %2 = vector.load %arg2[%c1, %c0_2, %c0_3] : memref<6x8x128xf32, #tpu.memory_space<vmem>>, vector<1x8x128xf32>
    %3 = vector.shape_cast %2 : vector<1x8x128xf32> to vector<8x128xf32>
    %c2 = arith.constant 2 : index
    %c0_4 = arith.constant 0 : index
    %c0_5 = arith.constant 0 : index
    %4 = vector.load %arg2[%c2, %c0_4, %c0_5] : memref<6x8x128xf32, #tpu.memory_space<vmem>>, vector<1x8x128xf32>
    %5 = vector.shape_cast %4 : vector<1x8x128xf32> to vector<8x128xf32>
    %c3 = arith.constant 3 : index
    %c0_6 = arith.constant 0 : index
    %c0_7 = arith.constant 0 : index
    %6 = vector.load %arg2[%c3, %c0_6, %c0_7] : memref<6x8x128xf32, #tpu.memory_space<vmem>>, vector<1x8x128xf32>
    %7 = vector.shape_cast %6 : vector<1x8x128xf32> to vector<8x128xf32>
    %c4 = arith.constant 4 : index
    %c0_8 = arith.constant 0 : index
    %c0_9 = arith.constant 0 : index
    %8 = vector.load %arg2[%c4, %c0_8, %c0_9] : memref<6x8x128xf32, #tpu.memory_space<vmem>>, vector<1x8x128xf32>
    %9 = vector.shape_cast %8 : vector<1x8x128xf32> to vector<8x128xf32>
    %c5 = arith.constant 5 : index
    %c0_10 = arith.constant 0 : index
    %c0_11 = arith.constant 0 : index
    %10 = vector.load %arg2[%c5, %c0_10, %c0_11] : memref<6x8x128xf32, #tpu.memory_space<vmem>>, vector<1x8x128xf32>
    %11 = vector.shape_cast %10 : vector<1x8x128xf32> to vector<8x128xf32>
    %cst = arith.constant 6.694380e-03 : f32
    %12 = vector.broadcast %cst : f32 to vector<8x128xf32>
    %13 = arith.mulf %12, %1 : vector<8x128xf32>
    %14 = arith.mulf %13, %1 : vector<8x128xf32>
    %cst_12 = arith.constant 1.000000e+00 : f32
    %15 = vector.broadcast %cst_12 : f32 to vector<8x128xf32>
    %16 = arith.subf %15, %14 : vector<8x128xf32>
    %17 = math.rsqrt %16 : vector<8x128xf32>
    %cst_13 = arith.constant 0x4AC2A532 : f32
    %18 = vector.broadcast %cst_13 : f32 to vector<8x128xf32>
    %19 = arith.mulf %18, %17 : vector<8x128xf32>
    %20 = arith.addf %19, %9 : vector<8x128xf32>
    %21 = arith.mulf %20, %3 : vector<8x128xf32>
    %22 = arith.mulf %21, %7 : vector<8x128xf32>
    %23 = arith.addf %19, %9 : vector<8x128xf32>
    %24 = arith.mulf %23, %3 : vector<8x128xf32>
    %25 = arith.mulf %24, %5 : vector<8x128xf32>
    %cst_14 = arith.constant 0.993305623 : f32
    %26 = vector.broadcast %cst_14 : f32 to vector<8x128xf32>
    %27 = arith.mulf %19, %26 : vector<8x128xf32>
    %28 = arith.addf %27, %9 : vector<8x128xf32>
    %29 = arith.mulf %28, %1 : vector<8x128xf32>
    %c0_15 = arith.constant 0 : index
    %30 = memref.load %arg1[%c0_15] : memref<16xf32, #tpu.memory_space<smem>>
    %31 = vector.broadcast %30 : f32 to vector<8x128xf32>
    %32 = arith.subf %22, %31 : vector<8x128xf32>
    %c1_16 = arith.constant 1 : index
    %33 = memref.load %arg1[%c1_16] : memref<16xf32, #tpu.memory_space<smem>>
    %34 = vector.broadcast %33 : f32 to vector<8x128xf32>
    %35 = arith.subf %25, %34 : vector<8x128xf32>
    %c2_17 = arith.constant 2 : index
    %36 = memref.load %arg1[%c2_17] : memref<16xf32, #tpu.memory_space<smem>>
    %37 = vector.broadcast %36 : f32 to vector<8x128xf32>
    %38 = arith.subf %29, %37 : vector<8x128xf32>
    %c3_18 = arith.constant 3 : index
    %39 = memref.load %arg1[%c3_18] : memref<16xf32, #tpu.memory_space<smem>>
    %c4_19 = arith.constant 4 : index
    %40 = memref.load %arg1[%c4_19] : memref<16xf32, #tpu.memory_space<smem>>
    %c5_20 = arith.constant 5 : index
    %41 = memref.load %arg1[%c5_20] : memref<16xf32, #tpu.memory_space<smem>>
    %c6 = arith.constant 6 : index
    %42 = memref.load %arg1[%c6] : memref<16xf32, #tpu.memory_space<smem>>
    %cst_21 = arith.constant 0.000000e+00 : f32
    %43 = arith.subf %cst_21, %41 : f32
    %44 = vector.broadcast %43 : f32 to vector<8x128xf32>
    %45 = arith.mulf %44, %32 : vector<8x128xf32>
    %46 = vector.broadcast %42 : f32 to vector<8x128xf32>
    %47 = arith.mulf %46, %35 : vector<8x128xf32>
    %48 = arith.addf %45, %47 : vector<8x128xf32>
    %cst_22 = arith.constant 0.000000e+00 : f32
    %49 = arith.subf %cst_22, %39 : f32
    %50 = arith.mulf %49, %42 : f32
    %51 = vector.broadcast %50 : f32 to vector<8x128xf32>
    %52 = arith.mulf %51, %32 : vector<8x128xf32>
    %53 = arith.mulf %39, %41 : f32
    %54 = vector.broadcast %53 : f32 to vector<8x128xf32>
    %55 = arith.mulf %54, %35 : vector<8x128xf32>
    %56 = arith.subf %52, %55 : vector<8x128xf32>
    %57 = vector.broadcast %40 : f32 to vector<8x128xf32>
    %58 = arith.mulf %57, %38 : vector<8x128xf32>
    %59 = arith.addf %56, %58 : vector<8x128xf32>
    %60 = arith.mulf %40, %42 : f32
    %61 = vector.broadcast %60 : f32 to vector<8x128xf32>
    %62 = arith.mulf %61, %32 : vector<8x128xf32>
    %63 = arith.mulf %40, %41 : f32
    %64 = vector.broadcast %63 : f32 to vector<8x128xf32>
    %65 = arith.mulf %64, %35 : vector<8x128xf32>
    %66 = arith.addf %62, %65 : vector<8x128xf32>
    %67 = vector.broadcast %39 : f32 to vector<8x128xf32>
    %68 = arith.mulf %67, %38 : vector<8x128xf32>
    %69 = arith.addf %66, %68 : vector<8x128xf32>
    %c7 = arith.constant 7 : index
    %70 = memref.load %arg1[%c7] : memref<16xf32, #tpu.memory_space<smem>>
    %71 = vector.broadcast %70 : f32 to vector<8x128xf32>
    %72 = arith.mulf %71, %48 : vector<8x128xf32>
    %c8 = arith.constant 8 : index
    %73 = memref.load %arg1[%c8] : memref<16xf32, #tpu.memory_space<smem>>
    %74 = vector.broadcast %73 : f32 to vector<8x128xf32>
    %75 = arith.mulf %74, %59 : vector<8x128xf32>
    %76 = arith.addf %72, %75 : vector<8x128xf32>
    %c9 = arith.constant 9 : index
    %77 = memref.load %arg1[%c9] : memref<16xf32, #tpu.memory_space<smem>>
    %78 = vector.broadcast %77 : f32 to vector<8x128xf32>
    %79 = arith.mulf %78, %69 : vector<8x128xf32>
    %80 = arith.addf %76, %79 : vector<8x128xf32>
    %c10 = arith.constant 10 : index
    %81 = memref.load %arg1[%c10] : memref<16xf32, #tpu.memory_space<smem>>
    %82 = vector.broadcast %81 : f32 to vector<8x128xf32>
    %83 = arith.mulf %82, %48 : vector<8x128xf32>
    %c11 = arith.constant 11 : index
    %84 = memref.load %arg1[%c11] : memref<16xf32, #tpu.memory_space<smem>>
    %85 = vector.broadcast %84 : f32 to vector<8x128xf32>
    %86 = arith.mulf %85, %59 : vector<8x128xf32>
    %87 = arith.addf %83, %86 : vector<8x128xf32>
    %c12 = arith.constant 12 : index
    %88 = memref.load %arg1[%c12] : memref<16xf32, #tpu.memory_space<smem>>
    %89 = vector.broadcast %88 : f32 to vector<8x128xf32>
    %90 = arith.mulf %89, %69 : vector<8x128xf32>
    %91 = arith.addf %87, %90 : vector<8x128xf32>
    %c13 = arith.constant 13 : index
    %92 = memref.load %arg1[%c13] : memref<16xf32, #tpu.memory_space<smem>>
    %93 = vector.broadcast %92 : f32 to vector<8x128xf32>
    %94 = arith.mulf %93, %48 : vector<8x128xf32>
    %c14 = arith.constant 14 : index
    %95 = memref.load %arg1[%c14] : memref<16xf32, #tpu.memory_space<smem>>
    %96 = vector.broadcast %95 : f32 to vector<8x128xf32>
    %97 = arith.mulf %96, %59 : vector<8x128xf32>
    %98 = arith.addf %94, %97 : vector<8x128xf32>
    %c15 = arith.constant 15 : index
    %99 = memref.load %arg1[%c15] : memref<16xf32, #tpu.memory_space<smem>>
    %100 = vector.broadcast %99 : f32 to vector<8x128xf32>
    %101 = arith.mulf %100, %69 : vector<8x128xf32>
    %102 = arith.addf %98, %101 : vector<8x128xf32>
    %103 = math.absf %80 : vector<8x128xf32>
    %104 = math.absf %91 : vector<8x128xf32>
    %105 = math.absf %102 : vector<8x128xf32>
    %cst_23 = arith.constant 0.000000e+00 : f32
    %106 = vector.broadcast %cst_23 : f32 to vector<8x128xf32>
    %107 = arith.cmpf ogt, %102, %106 : vector<8x128xf32>
    %108 = arith.cmpf ogt, %102, %103 : vector<8x128xf32>
    %109 = arith.andi %107, %108 : vector<8x128xi1>
    %110 = arith.cmpf ogt, %102, %104 : vector<8x128xf32>
    %111 = arith.andi %109, %110 : vector<8x128xi1>
    %cst_24 = arith.constant 0.000000e+00 : f32
    %112 = vector.broadcast %cst_24 : f32 to vector<8x128xf32>
    %113 = arith.cmpf olt, %102, %112 : vector<8x128xf32>
    %cst_25 = arith.constant 0.000000e+00 : f32
    %114 = vector.broadcast %cst_25 : f32 to vector<8x128xf32>
    %115 = arith.subf %114, %102 : vector<8x128xf32>
    %116 = arith.cmpf ogt, %115, %103 : vector<8x128xf32>
    %117 = arith.andi %113, %116 : vector<8x128xi1>
    %cst_26 = arith.constant 0.000000e+00 : f32
    %118 = vector.broadcast %cst_26 : f32 to vector<8x128xf32>
    %119 = arith.subf %118, %102 : vector<8x128xf32>
    %120 = arith.cmpf ogt, %119, %104 : vector<8x128xf32>
    %121 = arith.andi %117, %120 : vector<8x128xi1>
    %cst_27 = arith.constant 0.000000e+00 : f32
    %122 = vector.broadcast %cst_27 : f32 to vector<8x128xf32>
    %123 = arith.cmpf olt, %80, %122 : vector<8x128xf32>
    %cst_28 = arith.constant 0.000000e+00 : f32
    %124 = vector.broadcast %cst_28 : f32 to vector<8x128xf32>
    %125 = arith.subf %124, %80 : vector<8x128xf32>
    %126 = arith.cmpf ogt, %125, %105 : vector<8x128xf32>
    %127 = arith.andi %123, %126 : vector<8x128xi1>
    %cst_29 = arith.constant 0.000000e+00 : f32
    %128 = vector.broadcast %cst_29 : f32 to vector<8x128xf32>
    %129 = arith.subf %128, %80 : vector<8x128xf32>
    %130 = arith.cmpf ogt, %129, %104 : vector<8x128xf32>
    %131 = arith.andi %127, %130 : vector<8x128xi1>
    %cst_30 = arith.constant 0.000000e+00 : f32
    %132 = vector.broadcast %cst_30 : f32 to vector<8x128xf32>
    %133 = arith.cmpf ogt, %80, %132 : vector<8x128xf32>
    %134 = arith.cmpf ogt, %80, %105 : vector<8x128xf32>
    %135 = arith.andi %133, %134 : vector<8x128xi1>
    %136 = arith.cmpf ogt, %80, %104 : vector<8x128xf32>
    %137 = arith.andi %135, %136 : vector<8x128xi1>
    %138 = arith.ori %111, %121 : vector<8x128xi1>
    %139 = arith.ori %138, %131 : vector<8x128xi1>
    %140 = arith.ori %139, %137 : vector<8x128xi1>
    %cst_31 = arith.constant 0.000000e+00 : f32
    %141 = vector.broadcast %cst_31 : f32 to vector<8x128xf32>
    %142 = arith.subf %141, %102 : vector<8x128xf32>
    %143 = arith.select %137, %142, %80 : vector<8x128xi1>, vector<8x128xf32>
    %144 = arith.select %131, %102, %143 : vector<8x128xi1>, vector<8x128xf32>
    %cst_32 = arith.constant 0.000000e+00 : f32
    %145 = vector.broadcast %cst_32 : f32 to vector<8x128xf32>
    %146 = arith.subf %145, %91 : vector<8x128xf32>
    %147 = arith.select %121, %146, %91 : vector<8x128xi1>, vector<8x128xf32>
    %cst_33 = arith.constant 0.000000e+00 : f32
    %148 = vector.broadcast %cst_33 : f32 to vector<8x128xf32>
    %149 = arith.subf %148, %80 : vector<8x128xf32>
    %150 = arith.select %137, %80, %102 : vector<8x128xi1>, vector<8x128xf32>
    %151 = arith.select %131, %149, %150 : vector<8x128xi1>, vector<8x128xf32>
    %cst_34 = arith.constant 1.000000e+00 : f32
    %152 = vector.broadcast %cst_34 : f32 to vector<8x128xf32>
    %153 = arith.select %140, %151, %152 : vector<8x128xi1>, vector<8x128xf32>
    %154 = tpu.reciprocal %153 : vector<8x128xf32> -> vector<8x128xf32>
    %155 = arith.mulf %144, %154 : vector<8x128xf32>
    %cst_35 = arith.constant 1.024000e+03 : f32
    %156 = vector.broadcast %cst_35 : f32 to vector<8x128xf32>
    %157 = arith.mulf %155, %156 : vector<8x128xf32>
    %cst_36 = arith.constant 1.024000e+03 : f32
    %158 = vector.broadcast %cst_36 : f32 to vector<8x128xf32>
    %159 = arith.addf %157, %158 : vector<8x128xf32>
    %160 = math.floor %159 : vector<8x128xf32>
    %cst_37 = arith.constant 0.000000e+00 : f32
    %cst_38 = arith.constant 2.047000e+03 : f32
    %161 = vector.broadcast %cst_37 : f32 to vector<8x128xf32>
    %162 = arith.maximumf %161, %160 : vector<8x128xf32>
    %163 = vector.broadcast %cst_38 : f32 to vector<8x128xf32>
    %164 = arith.minimumf %163, %162 : vector<8x128xf32>
    %165 = arith.mulf %147, %154 : vector<8x128xf32>
    %cst_39 = arith.constant 1.024000e+03 : f32
    %166 = vector.broadcast %cst_39 : f32 to vector<8x128xf32>
    %167 = arith.mulf %165, %166 : vector<8x128xf32>
    %cst_40 = arith.constant 1.024000e+03 : f32
    %168 = vector.broadcast %cst_40 : f32 to vector<8x128xf32>
    %169 = arith.addf %167, %168 : vector<8x128xf32>
    %170 = math.floor %169 : vector<8x128xf32>
    %cst_41 = arith.constant 0.000000e+00 : f32
    %cst_42 = arith.constant 2.047000e+03 : f32
    %171 = vector.broadcast %cst_41 : f32 to vector<8x128xf32>
    %172 = arith.maximumf %171, %170 : vector<8x128xf32>
    %173 = vector.broadcast %cst_42 : f32 to vector<8x128xf32>
    %174 = arith.minimumf %173, %172 : vector<8x128xf32>
    %cst_43 = arith.constant 3.000000e+00 : f32
    %cst_44 = arith.constant -1.000000e+00 : f32
    %175 = vector.broadcast %cst_43 : f32 to vector<8x128xf32>
    %176 = vector.broadcast %cst_44 : f32 to vector<8x128xf32>
    %177 = arith.select %137, %175, %176 : vector<8x128xi1>, vector<8x128xf32>
    %cst_45 = arith.constant 2.000000e+00 : f32
    %178 = vector.broadcast %cst_45 : f32 to vector<8x128xf32>
    %179 = arith.select %131, %178, %177 : vector<8x128xi1>, vector<8x128xf32>
    %cst_46 = arith.constant 1.000000e+00 : f32
    %180 = vector.broadcast %cst_46 : f32 to vector<8x128xf32>
    %181 = arith.select %121, %180, %179 : vector<8x128xi1>, vector<8x128xf32>
    %cst_47 = arith.constant 0.000000e+00 : f32
    %182 = vector.broadcast %cst_47 : f32 to vector<8x128xf32>
    %183 = arith.select %111, %182, %181 : vector<8x128xi1>, vector<8x128xf32>
    %c0_48 = arith.constant 0 : index
    %c0_49 = arith.constant 0 : index
    %c0_50 = arith.constant 0 : index
    %184 = vector.load %arg3[%c0_48, %c0_49, %c0_50] : memref<4x8x128xf32, #tpu.memory_space<vmem>>, vector<1x8x128xf32>
    %185 = vector.shape_cast %184 : vector<1x8x128xf32> to vector<8x128xf32>
    %186 = vector.shape_cast %164 : vector<8x128xf32> to vector<1x8x128xf32>
    tpu.vector_store %arg3[%c0_48, %c0_49, %c0_50], %186 {strides = array<i32>} : memref<4x8x128xf32, #tpu.memory_space<vmem>>, vector<1x8x128xf32>,
    %c1_51 = arith.constant 1 : index
    %c0_52 = arith.constant 0 : index
    %c0_53 = arith.constant 0 : index
    %187 = vector.load %arg3[%c1_51, %c0_52, %c0_53] : memref<4x8x128xf32, #tpu.memory_space<vmem>>, vector<1x8x128xf32>
    %188 = vector.shape_cast %187 : vector<1x8x128xf32> to vector<8x128xf32>
    %189 = vector.shape_cast %174 : vector<8x128xf32> to vector<1x8x128xf32>
    tpu.vector_store %arg3[%c1_51, %c0_52, %c0_53], %189 {strides = array<i32>} : memref<4x8x128xf32, #tpu.memory_space<vmem>>, vector<1x8x128xf32>,
    %c2_54 = arith.constant 2 : index
    %c0_55 = arith.constant 0 : index
    %c0_56 = arith.constant 0 : index
    %190 = vector.load %arg3[%c2_54, %c0_55, %c0_56] : memref<4x8x128xf32, #tpu.memory_space<vmem>>, vector<1x8x128xf32>
    %191 = vector.shape_cast %190 : vector<1x8x128xf32> to vector<8x128xf32>
    %192 = vector.shape_cast %11 : vector<8x128xf32> to vector<1x8x128xf32>
    tpu.vector_store %arg3[%c2_54, %c0_55, %c0_56], %192 {strides = array<i32>} : memref<4x8x128xf32, #tpu.memory_space<vmem>>, vector<1x8x128xf32>,
    %c3_57 = arith.constant 3 : index
    %c0_58 = arith.constant 0 : index
    %c0_59 = arith.constant 0 : index
    %193 = vector.load %arg3[%c3_57, %c0_58, %c0_59] : memref<4x8x128xf32, #tpu.memory_space<vmem>>, vector<1x8x128xf32>
    %194 = vector.shape_cast %193 : vector<1x8x128xf32> to vector<8x128xf32>
    %195 = vector.shape_cast %183 : vector<8x128xf32> to vector<1x8x128xf32>
    tpu.vector_store %arg3[%c3_57, %c0_58, %c0_59], %195 {strides = array<i32>} : memref<4x8x128xf32, #tpu.memory_space<vmem>>, vector<1x8x128xf32>,
    return
  }
  func.func @transform_0(%arg0: i32) -> i32 {
    %c0_i32 = arith.constant 0 : i32
    %c0_i32_0 = arith.constant 0 : i32
    return %c0_i32 : i32
  }
  func.func @transform_1(%arg0: i32) -> (i32, i32, i32) {
    %c0_i32 = arith.constant 0 : i32
    %c0_i32_0 = arith.constant 0 : i32
    %c0_i32_1 = arith.constant 0 : i32
    return %c0_i32, %arg0, %c0_i32_0 : i32, i32, i32
  }
  func.func @transform_2(%arg0: i32) -> (i32, i32, i32) {
    %c0_i32 = arith.constant 0 : i32
    %c0_i32_0 = arith.constant 0 : i32
    %c0_i32_1 = arith.constant 0 : i32
    return %c0_i32, %arg0, %c0_i32_0 : i32, i32, i32
  }
}

</mosaic_0001>

<bundles_post_ra>
// kernel: tpu_custom_call.1
= control target key start
LH: loop header
LB: loop body
LE: loop exit
PB: predicated region body
PF: predicated region fallthrough
CT: control target
= control target key end

     0   :  { %7 = vsyncpa [#allocation5], 0  ;;  %s426_s0 = inlined_call_operand.hbm [shape: f32[16], index: 0, kind: input, shape index: {}]   ;;  %s427_s1 = inlined_call_operand.hbm [shape: f32[6,8,128], index: 1, kind: input, shape index: {}]   ;;  %s428_s2 = inlined_call_operand.hbm [shape: f32[4,8,128], index: 2, kind: output, shape index: {}]  }
   0x1   :  { %8 = vsyncpa [#allocation3], 0 }
   0x2   :  { %9 = vsyncpa [#allocation4], 0  ;;  %s289_s9 = smov [#allocation2]   ;;  %s290_s12 = smov [#allocation6]  }
   0x3   :  { %17 = dma.hbm_to_smem %s426_s0, 16, %s289_s9, [#allocation5]  }
   0x4   :  { %s23_s13 = sshll.u32 %s290_s12, 4  ;;  %s24_s13 = int_to_ptr.vmem [resolvable:$true] %s23_s13 }
   0x5   :  { %s251_s14 = scalar_lea.vmem %s24_s13, 768  ;;  %p256_p1 = scmp.lt.s32.totalorder %s24_s13, %s24_s13 }
   0x6   :  { %p252_p0 = scmp.ne.s32.totalorder %s24_s13, %s251_s14  ;;  %p257_p2 = scmp.lt.s32.totalorder %s251_s14, %s251_s14 }
   0x8   :  { %p258_p3 = por %p257_p2, %p256_p1 }
   0xa   :  { %p259_p4 = pnand %p258_p3, %p252_p0 }
   0xc   :  { %262 = shalt.err (!%p259_p4)
}
   0xd   :  { %s291_s15 = smov 128   ;;  %s292_s16 = smov 8  }
   0xe   :  { %29 = dma.hbm_to_vmem [thread:$0]  %s427_s1, 768, %s24_s13, [#allocation3], %s291_s15, %s291_s15, %s292_s16  }
   0xf   :  { %283 = dma.done.wait [#allocation5], 16  }
  0x10   :  { %284 = vsyncadd [#allocation5], 4294967280 }
  0x11   :  { %285 = dma.done.wait [#allocation3], 768  }
  0x12   :  { %286 = vsyncadd [#allocation3], 4294966528 }
  0x13   :  { %36 = sfence }
  0x14   :  { %v37_v0 = vld [vmem:[#allocation6] sm:$0xff]  ;;  %v47_v2 = vld [vmem:[#allocation6 + $0x28] sm:$0xff]  ;;  %s319_s0 = sld [smem:[#allocation2]]  ;;  %v41_v11 = vld [vmem:[#allocation6 + $0x10] sm:$0xff]  ;;  %s294_s11 = smov [#allocation7]  }
  0x15   :  { %v48_v1 = vmul.f32 0.00669438, %v37_v0  ;;  %189 = vst [vmem:[#allocation7 + $0x10] sm:$0xff] %v47_v2  ;;  %s321_s19 = sld [smem:[#allocation2 + $0x3]]  ;;  %v45_v6 = vld [vmem:[#allocation6 + $0x20] sm:$0xff]  ;;  %v39_v8 = vld [vmem:[#allocation6 + $0x8] sm:$0xff] }
  0x16   :  { %s323_s20 = sld [smem:[#allocation2 + $0x1]]  ;;  %v43_v12 = vld [vmem:[#allocation6 + $0x18] sm:$0xff]  ;;  %s197_s12 = sshll.u32 %s294_s11, 4  ;;  %s198_s12 = int_to_ptr.vmem [resolvable:$true] %s197_s12 }
  0x17   :  { %v49_v3 = vmul.f32 %v48_v1, %v37_v0  ;;  %s325_s1 = sld [smem:[#allocation2 + $0x2]]  ;;  %s263_s13 = scalar_lea.vmem %s198_s12, 512 }
  0x18   :  { %s327_s21 = sld [smem:[#allocation2 + $0x4]]  ;;  %p264_p5 = scmp.ne.s32.totalorder %s198_s12, %s263_s13 }
  0x19   :  { %v50_v4 = vsub.f32 1.0, %v49_v3  ;;  %s329_s22 = sld [smem:[#allocation2 + $0x5]]  ;;  %p268_p6 = scmp.lt.s32.totalorder %s198_s12, %s198_s12 }
  0x1a   :  { %s331_s23 = sld [smem:[#allocation2 + $0x6]]  ;;  %v61_v15 = vstv %s319_s0  ;;  %p269_p7 = scmp.lt.s32.totalorder %s263_s13, %s263_s13 }
  0x1b   :  { %231 = vrsqrt.f32 %v50_v4  ;;  %s333_s24 = sld [smem:[#allocation2 + $0x7]]  ;;  %v97_v19 = vstv %s321_s19 }
  0x1c   :  { %s335_s25 = sld [smem:[#allocation2 + $0x8]]  ;;  %v64_v16 = vstv %s323_s20  ;;  %p270_p8 = por %p269_p7, %p268_p6 }
  0x1d   :  { %s79_s26 = ssub.f32 0.0, %s321_s19  ;;  %v67_v17 = vstv %s325_s1 }
  0x1e   :  { %s338_s27 = sld [smem:[#allocation2 + $0x9]]  ;;  %v87_v18 = vstv %s327_s21  ;;  %p271_p9 = pnand %p270_p8, %p264_p5 }
  0x1f   :  { %s73_s28 = ssub.f32 0.0, %s329_s22  ;;  %s83_s30 = smul.f32 %s329_s22, %s321_s19 }
  0x20   :  { %s341_s29 = sld [smem:[#allocation2 + $0xa]]  ;;  %s348_s4 = smul.f32 %s331_s23, %s79_s26  ;;  %v76_v23 = vstv %s331_s23 }
  0x21   :  { %s345_s3 = sld [smem:[#allocation2 + $0xd]]  ;;  %s90_s6 = smul.f32 %s331_s23, %s327_s21  ;;  %v74_v24 = vstv %s73_s28  ;;  %v84_v26 = vstv %s83_s30  ;;  %v101_v32 = vstv %s333_s24 }
  0x22   :  { %s350_s5 = sld [smem:[#allocation2 + $0xb]]  ;;  %s93_s8 = smul.f32 %s329_s22, %s327_s21  ;;  %v81_v25 = vstv %s348_s4  ;;  %v104_v33 = vstv %s335_s25 }
  0x23   :  { %s354_s7 = sld [smem:[#allocation2 + $0xc]]  ;;  %v91_v27 = vstv %s90_s6 }
  0x24   :  { %s359_s9 = sld [smem:[#allocation2 + $0xe]]  ;;  %v94_v31 = vstv %s93_s8  ;;  %v108_v46 = vstv %s338_s27 }
  0x25   :  { %s365_s10 = sld [smem:[#allocation2 + $0xf]] }
  0x26   :  { %v112_v34 = vstv %s341_s29 }
  0x27   :  { %v123_v35 = vstv %s345_s3 }
  0x28   :  { %v232_v5 = vpop.eup %231  ;;  %v115_v47 = vstv %s350_s5 }
  0x29   :  { %v52_v7 = vmul.f32 6378137.0, %v232_v5  ;;  %v119_v49 = vstv %s354_s7 }
  0x2a   :  { %v126_v50 = vstv %s359_s9 }
  0x2b   :  { %v53_v9 = vadd.f32 %v52_v7, %v45_v6  ;;  %v57_v10 = vmul.f32 0.9933056, %v52_v7  ;;  %v130_v51 = vstv %s365_s10 }
  0x2d   :  { %v54_v13 = vmul.f32 %v53_v9, %v39_v8  ;;  %v58_v14 = vadd.f32 %v57_v10, %v45_v6 }
  0x2f   :  { %v55_v20 = vmul.f32 %v54_v13, %v43_v12  ;;  %v56_v21 = vmul.f32 %v54_v13, %v41_v11  ;;  %v59_v22 = vmul.f32 %v58_v14, %v37_v0 }
  0x31   :  { %v62_v28 = vsub.f32 %v55_v20, %v61_v15  ;;  %v65_v29 = vsub.f32 %v56_v21, %v64_v16  ;;  %v68_v30 = vsub.f32 %v59_v22, %v67_v17  ;;  %v293_v15 = vmov -1.0  }
  0x33   :  { %v75_v36 = vmul.f32 %v74_v24, %v62_v28  ;;  %v77_v37 = vmul.f32 %v76_v23, %v65_v29  ;;  %v82_v38 = vmul.f32 %v81_v25, %v62_v28  ;;  %v85_v39 = vmul.f32 %v84_v26, %v65_v29 }
  0x34   :  { %v88_v40 = vmul.f32 %v87_v18, %v68_v30  ;;  %v92_v41 = vmul.f32 %v91_v27, %v62_v28  ;;  %v95_v42 = vmul.f32 %v94_v31, %v65_v29  ;;  %v98_v43 = vmul.f32 %v97_v19, %v68_v30 }
  0x35   :  { %v78_v44 = vadd.f32 %v77_v37, %v75_v36  ;;  %v86_v45 = vsub.f32 %v82_v38, %v85_v39 }
  0x36   :  { %v96_v48 = vadd.f32 %v95_v42, %v92_v41 }
  0x37   :  { %v89_v52 = vadd.f32 %v88_v40, %v86_v45  ;;  %v102_v53 = vmul.f32 %v101_v32, %v78_v44  ;;  %v113_v54 = vmul.f32 %v112_v34, %v78_v44  ;;  %v124_v55 = vmul.f32 %v123_v35, %v78_v44 }
  0x38   :  { %v99_v56 = vadd.f32 %v98_v43, %v96_v48 }
  0x39   :  { %v105_v57 = vmul.f32 %v104_v33, %v89_v52  ;;  %v116_v58 = vmul.f32 %v115_v47, %v89_v52  ;;  %v127_v59 = vmul.f32 %v126_v50, %v89_v52 }
  0x3a   :  { %v109_v60 = vmul.f32 %v108_v46, %v99_v56  ;;  %v120_v61 = vmul.f32 %v119_v49, %v99_v56  ;;  %v131_v62 = vmul.f32 %v130_v51, %v99_v56 }
  0x3b   :  { %v106_v63 = vadd.f32 %v105_v57, %v102_v53  ;;  %v117_v0 = vadd.f32 %v116_v58, %v113_v54  ;;  %v128_v1 = vadd.f32 %v127_v59, %v124_v55 }
  0x3d   :  { %v110_v2 = vadd.f32 %v109_v60, %v106_v63  ;;  %v121_v3 = vadd.f32 %v120_v61, %v117_v0  ;;  %v132_v4 = vadd.f32 %v131_v62, %v128_v1 }
  0x3f   :  { %v133_v5 = vand.u32 2147483647, %v110_v2  ;;  %v134_v6 = vand.u32 2147483647, %v121_v3  ;;  %v135_v7 = vand.u32 2147483647, %v132_v4 }
  0x40   :  { %vm136_vm0 = vcmp.gt.f32.partialorder %v132_v4, 0.0  ;;  %v142_v8 = vsub.f32 0.0, %v132_v4  ;;  %vm141_vm3 = vcmp.lt.f32.partialorder %v132_v4, 0.0  ;;  %v148_v9 = vsub.f32 0.0, %v110_v2 }
  0x41   :  { %vm137_vm1 = vcmp.gt.f32.partialorder %v132_v4, %v133_v5  ;;  %vm139_vm2 = vcmp.gt.f32.partialorder %v132_v4, %v134_v6  ;;  %vm147_vm8 = vcmp.lt.f32.partialorder %v110_v2, 0.0  ;;  %vm153_vm13 = vcmp.gt.f32.partialorder %v110_v2, 0.0 }
  0x42   :  { %vm138_vm4 = vmand %vm136_vm0, %vm137_vm1  ;;  %vm143_vm5 = vcmp.gt.f32.partialorder %v142_v8, %v133_v5  ;;  %vm145_vm6 = vcmp.gt.f32.partialorder %v142_v8, %v134_v6  ;;  %vm149_vm9 = vcmp.gt.f32.partialorder %v148_v9, %v135_v7  ;;  %vm151_vm11 = vcmp.gt.f32.partialorder %v148_v9, %v134_v6 }
  0x43   :  { %vm378_vm7 = vmand %vm138_vm4, %vm139_vm2  ;;  %vm154_vm14 = vcmp.gt.f32.partialorder %v110_v2, %v135_v7  ;;  %vm156_vm0 = vcmp.gt.f32.partialorder %v110_v2, %v134_v6  ;;  %v163_v22 = vsub.f32 0.0, %v121_v3 }
  0x44   :  { %vm144_vm10 = vmand %vm141_vm3, %vm143_vm5 }
  0x45   :  { %vm382_vm12 = vmand %vm144_vm10, %vm145_vm6 }
  0x46   :  { %vm150_vm15 = vmand %vm147_vm8, %vm149_vm9  ;;  %v164_v25 = vsel %vm382_vm12, %v163_v22, %v121_v3 }
  0x47   :  { %vm386_vm1 = vmand %vm150_vm15, %vm151_vm11 }
  0x48   :  { %vm155_vm2 = vmand %vm153_vm13, %vm154_vm14 }
  0x49   :  { %vm390_vm4 = vmand %vm155_vm2, %vm156_vm0 }
  0x4a   :  { %vm158_vm3 = vmor %vm378_vm7, %vm382_vm12  ;;  %v165_v14 = vsel %vm390_vm4, %v110_v2, %v132_v4  ;;  %v181_v16 = vsel %vm390_vm4, 3.0, %v293_v15  ;;  %v161_v23 = vsel %vm390_vm4, %v142_v8, %v110_v2 }
  0x4b   :  { %vm159_vm5 = vmor %vm158_vm3, %vm386_vm1  ;;  %v166_v17 = vsel %vm386_vm1, %v148_v9, %v165_v14  ;;  %v182_v18 = vsel %vm386_vm1, 2.0, %v181_v16  ;;  %v162_v24 = vsel %vm386_vm1, %v132_v4, %v161_v23 }
  0x4c   :  { %vm160_vm6 = vmor %vm159_vm5, %vm390_vm4  ;;  %v183_v19 = vsel %vm382_vm12, 1.0, %v182_v18 }
  0x4d   :  { %v167_v20 = vsel %vm160_vm6, %v166_v17, 1.0  ;;  %v184_v21 = vsel %vm378_vm7, 0.0, %v183_v19 }
  0x4e   :  { %233 = vrcp.f32 %v167_v20  ;;  %191 = vst [vmem:[#allocation7 + $0x18] sm:$0xff] %v184_v21 }
  0x5b   :  { %v234_v26 = vpop.eup %233 }
  0x5c   :  { %v169_v27 = vmul.f32 %v234_v26, %v162_v24  ;;  %v175_v28 = vmul.f32 %v234_v26, %v164_v25 }
  0x5e   :  { %v170_v29 = vmul.f32 1024.0, %v169_v27  ;;  %v176_v30 = vmul.f32 1024.0, %v175_v28 }
  0x60   :  { %v171_v31 = vadd.f32 1024.0, %v170_v29  ;;  %v177_v32 = vadd.f32 1024.0, %v176_v30 }
  0x62   :  { %v172_v33 = vfloor.f32 %v171_v31  ;;  %v178_v34 = vfloor.f32 %v177_v32 }
  0x64   :  { %v173_v35 = vmax.f32 %v172_v33, 0.0  ;;  %v179_v36 = vmax.f32 %v178_v34, 0.0 }
  0x66   :  { %v174_v37 = vmin.f32 %v173_v35, 2047.0  ;;  %v180_v38 = vmin.f32 %v179_v36, 2047.0 }
  0x68   :  { %185 = vst [vmem:[#allocation7] sm:$0xff] %v174_v37  ;;  %187 = vst [vmem:[#allocation7 + $0x8] sm:$0xff] %v180_v38 }
  0x69   :  { %274 = shalt.err (!%p271_p9)
}
  0x6a   :  { %203 = dma.vmem_to_hbm [thread:$0]  %s198_s12, 512, %s428_s2, [#allocation4], %s291_s15, %s291_s15, %s292_s16  }
  0x6b   :  { %287 = dma.done.wait [#allocation4], 512  }
  0x6c   :  { %288 = vsyncadd [#allocation4], 4294966784 }
  0x6d   :  { %207 = vsyncpa [#allocation3], 1 }
  0x6e   :  { %208 = vsyncpa [#allocation4], 1 }
  0x6f   :  { %209 = vsyncpa [#allocation5], 1 }

</bundles_post_ra>
